<compile_context>
chip_gen: v6e
topology: v6e:2x2x1
jax: 0.10.0
libtpu: 0.0.40
codegen_flags: <defaults>
</compile_context>

<pallas_src>
import functools

import jax
import jax.numpy as jnp
from jax.experimental import pallas as pl
from jax.experimental.pallas import tpu as pltpu


def _layernorm_kernel(x_ref, w_ref, b_ref, o_ref, *, eps, c):
    # x_ref: (TM, C) rows to normalize; w_ref / b_ref: (1, C) float32; o_ref: (TM, C).
    x = x_ref[...].astype(jnp.float32)

    # Row reductions on the MXU (dot with ones column) — keeps the XLU free.
    ones_col = jnp.ones((c, 1), dtype=jnp.float32)
    inv_c = jnp.float32(1.0 / c)
    mu = jnp.dot(x, ones_col, preferred_element_type=jnp.float32) * inv_c   # (TM, 1)
    xc = x - mu
    var = jnp.dot(xc * xc, ones_col, preferred_element_type=jnp.float32) * inv_c

    inv = jax.lax.rsqrt(var + eps)                                          # EUP
    w = w_ref[...]
    b = b_ref[...]
    o_ref[...] = (xc * inv * w + b).astype(o_ref.dtype)


def _sublane_multiple(dtype):
    # 8 for 4-byte dtypes, 16 for 2-byte, 32 for 1-byte (packed sublanes).
    return max(8, 32 // jnp.dtype(dtype).itemsize)


def withbias_layernorm(x, weight, bias, *, eps=1e-5,
                       target_tile_bytes=2 * 1024 * 1024, min_grid_steps=8):
    """LayerNorm over the last axis with affine weight/bias (torch semantics)."""
    orig_shape = x.shape
    C = orig_shape[-1]
    M = 1
    for d in orig_shape[:-1]:
        M *= d
    x2 = x.reshape(M, C)

    itemsize = jnp.dtype(x.dtype).itemsize
    sub = _sublane_multiple(x.dtype)

    # Auto-size the row tile: ~target_tile_bytes per input block, rounded down
    # to a sublane multiple, capped so the grid keeps >= min_grid_steps steps.
    tm = max(sub, (target_tile_bytes // (C * itemsize) // sub) * sub)
    tm_cap = max(sub, pl.cdiv(pl.cdiv(M, min_grid_steps), sub) * sub)
    tm = min(tm, tm_cap)
    grid_rows = pl.cdiv(M, tm)   # last block may be ragged; writes are masked.

    # Parameters stay in float32 (kernel computes in f32 anyway).
    w2 = weight.reshape(1, C).astype(jnp.float32)
    b2 = bias.reshape(1, C).astype(jnp.float32)

    cost = pl.CostEstimate(
        flops=10 * M * C,
        transcendentals=M,
        bytes_accessed=2 * M * C * itemsize + 2 * C * 4,
    )

    out = pl.pallas_call(
        functools.partial(_layernorm_kernel, eps=eps, c=C),
        out_shape=jax.ShapeDtypeStruct((M, C), x.dtype),
        grid_spec=pltpu.PrefetchScalarGridSpec(
            num_scalar_prefetch=0,
            grid=(grid_rows,),
            in_specs=[
                pl.BlockSpec((tm, C), lambda i: (i, 0)),   # activations
                pl.BlockSpec((1, C), lambda i: (0, 0)),    # weight: resident
                pl.BlockSpec((1, C), lambda i: (0, 0)),    # bias:   resident
            ],
            out_specs=pl.BlockSpec((tm, C), lambda i: (i, 0)),
        ),
        compiler_params=pltpu.CompilerParams(
            dimension_semantics=("parallel",),
        ),
        cost_estimate=cost,
    )(x2, w2, b2)

    return out.reshape(orig_shape)


def _reference_layernorm(x, weight, bias, eps=1e-5):
    xf = x.astype(jnp.float32)
    mu = jnp.mean(xf, axis=-1, keepdims=True)
    var = jnp.mean((xf - mu) ** 2, axis=-1, keepdims=True)
    out = (xf - mu) / jnp.sqrt(var + eps) * weight.astype(jnp.float32) + bias.astype(jnp.float32)
    return out.astype(x.dtype)


if __name__ == "__main__":
    key = jax.random.PRNGKey(0)

    # Typical Restormer usage: (B, H*W, C) tokens, LayerNorm over C (lane-dense).
    B, HW, C = 2, 256, 128
    x = jax.random.normal(key, (B, HW, C), dtype=jnp.float32)
    weight = jnp.ones((C,), dtype=jnp.float32)   # module init (requires_grad=False)
    bias = jnp.zeros((C,), dtype=jnp.float32)

    out = jax.block_until_ready(withbias_layernorm(x, weight, bias))
    assert out.shape == x.shape, out.shape
    ref = _reference_layernorm(x, weight, bias)
    assert jnp.allclose(out, ref, atol=1e-4, rtol=1e-4)

    # Non-128 channel count + non-trivial affine params.
    k1, k2, k3 = jax.random.split(jax.random.PRNGKey(1), 3)
    B2, N2, C2 = 2, 20, 48
    x2 = jax.random.normal(k1, (B2, N2, C2), dtype=jnp.float32)
    w2 = jax.random.normal(k2, (C2,), dtype=jnp.float32)
    b2 = jax.random.normal(k3, (C2,), dtype=jnp.float32)
    out2 = jax.block_until_ready(withbias_layernorm(x2, w2, b2))
    ref2 = _reference_layernorm(x2, w2, b2)
    assert out2.shape == x2.shape, out2.shape
    assert jnp.allclose(out2, ref2, atol=1e-4, rtol=1e-4)

    # Ragged row count (last grid block partially valid -> masked writes).
    x3 = jax.random.normal(jax.random.PRNGKey(2), (1, 13, 48), dtype=jnp.float32)
    out3 = jax.block_until_ready(withbias_layernorm(x3, w2, b2))
    ref3 = _reference_layernorm(x3, w2, b2)
    assert out3.shape == x3.shape, out3.shape
    assert jnp.allclose(out3, ref3, atol=1e-4, rtol=1e-4)

    print("KERNEL_OK")
</pallas_src>

<mosaic_0001>
module attributes {stable_mosaic.version = 11 : i64} {
  func.func @_layernorm_kernel(%arg0: i32, %arg1: memref<64x128xf32, #tpu.memory_space<vmem>>, %arg2: memref<1x128xf32, #tpu.memory_space<vmem>>, %arg3: memref<1x128xf32, #tpu.memory_space<vmem>>, %arg4: memref<64x128xf32, #tpu.memory_space<vmem>>) attributes {dimension_semantics = [#tpu.dimension_semantics<parallel>], iteration_bounds = array<i64: 8>, scalar_prefetch = 0 : i64, scratch_operands = 0 : i64, tpu.core_type = #tpu.core_type<tc>, window_params = [{transform_indices = @transform_0, window_bounds = array<i64: 64, 128>}, {pipeline_mode = #tpu.pipeline_mode<synchronous>, transform_indices = @transform_1, window_bounds = array<i64: 1, 128>}, {pipeline_mode = #tpu.pipeline_mode<synchronous>, transform_indices = @transform_2, window_bounds = array<i64: 1, 128>}, {transform_indices = @transform_3, window_bounds = array<i64: 64, 128>}]} {
    %c0 = arith.constant 0 : index
    %c0_0 = arith.constant 0 : index
    %0 = vector.load %arg1[%c0, %c0_0] : memref<64x128xf32, #tpu.memory_space<vmem>>, vector<64x128xf32>
    %cst = arith.constant 1.000000e+00 : f32
    %1 = vector.broadcast %cst : f32 to vector<128x1xf32>
    %cst_1 = arith.constant dense<0.000000e+00> : vector<64x1xf32>
    %2 = tpu.matmul %0, %1, %cst_1 {dimension_numbers = #tpu.dot_dimension_numbers<[1], [0], [0], [1], [0, 0, 1, 1], [], []>} : vector<64x128xf32>, vector<128x1xf32>, vector<64x1xf32> -> vector<64x1xf32>
    %cst_2 = arith.constant 7.812500e-03 : f32
    %3 = vector.broadcast %cst_2 : f32 to vector<64x1xf32>
    %4 = arith.mulf %2, %3 : vector<64x1xf32>
    %5 = vector.broadcast %4 : vector<64x1xf32> to vector<64x128xf32>
    %6 = arith.subf %0, %5 : vector<64x128xf32>
    %7 = arith.mulf %6, %6 : vector<64x128xf32>
    %cst_3 = arith.constant dense<0.000000e+00> : vector<64x1xf32>
    %8 = tpu.matmul %7, %1, %cst_3 {dimension_numbers = #tpu.dot_dimension_numbers<[1], [0], [0], [1], [0, 0, 1, 1], [], []>} : vector<64x128xf32>, vector<128x1xf32>, vector<64x1xf32> -> vector<64x1xf32>
    %cst_4 = arith.constant 7.812500e-03 : f32
    %9 = vector.broadcast %cst_4 : f32 to vector<64x1xf32>
    %10 = arith.mulf %8, %9 : vector<64x1xf32>
    %cst_5 = arith.constant 9.99999974E-6 : f32
    %11 = vector.broadcast %cst_5 : f32 to vector<64x1xf32>
    %12 = arith.addf %10, %11 : vector<64x1xf32>
    %13 = math.rsqrt %12 : vector<64x1xf32>
    %c0_6 = arith.constant 0 : index
    %c0_7 = arith.constant 0 : index
    %14 = vector.load %arg2[%c0_6, %c0_7] : memref<1x128xf32, #tpu.memory_space<vmem>>, vector<1x128xf32>
    %c0_8 = arith.constant 0 : index
    %c0_9 = arith.constant 0 : index
    %15 = vector.load %arg3[%c0_8, %c0_9] : memref<1x128xf32, #tpu.memory_space<vmem>>, vector<1x128xf32>
    %16 = vector.broadcast %13 : vector<64x1xf32> to vector<64x128xf32>
    %17 = arith.mulf %6, %16 : vector<64x128xf32>
    %18 = vector.broadcast %14 : vector<1x128xf32> to vector<64x128xf32>
    %19 = arith.mulf %17, %18 : vector<64x128xf32>
    %20 = vector.broadcast %15 : vector<1x128xf32> to vector<64x128xf32>
    %21 = arith.addf %19, %20 : vector<64x128xf32>
    %c0_10 = arith.constant 0 : index
    %c0_11 = arith.constant 0 : index
    %22 = vector.load %arg4[%c0_10, %c0_11] : memref<64x128xf32, #tpu.memory_space<vmem>>, vector<64x128xf32>
    tpu.vector_store %arg4[%c0_10, %c0_11], %21 {strides = array<i32>} : memref<64x128xf32, #tpu.memory_space<vmem>>, vector<64x128xf32>,
    return
  }
  func.func @transform_0(%arg0: i32) -> (i32, i32) {
    %c0_i32 = arith.constant 0 : i32
    %c0_i32_0 = arith.constant 0 : i32
    return %arg0, %c0_i32 : i32, i32
  }
  func.func @transform_1(%arg0: i32) -> (i32, i32) {
    %c0_i32 = arith.constant 0 : i32
    %c0_i32_0 = arith.constant 0 : i32
    %c0_i32_1 = arith.constant 0 : i32
    return %c0_i32, %c0_i32_0 : i32, i32
  }
  func.func @transform_2(%arg0: i32) -> (i32, i32) {
    %c0_i32 = arith.constant 0 : i32
    %c0_i32_0 = arith.constant 0 : i32
    %c0_i32_1 = arith.constant 0 : i32
    return %c0_i32, %c0_i32_0 : i32, i32
  }
  func.func @transform_3(%arg0: i32) -> (i32, i32) {
    %c0_i32 = arith.constant 0 : i32
    %c0_i32_0 = arith.constant 0 : i32
    return %arg0, %c0_i32 : i32, i32
  }
}

</mosaic_0001>

<bundles_post_ra>
// kernel: tpu_custom_call.1
= control target key start
LH: loop header
LB: loop body
LE: loop exit
PB: predicated region body
PF: predicated region fallthrough
CT: control target
= control target key end

     0   :  { %8 = vsyncpa [#allocation3], 0  ;;  %s1307_s0 = inlined_call_operand.hbm [shape: f32[512,128], index: 0, kind: input, shape index: {}]   ;;  %s1308_s1 = inlined_call_operand.vmem [shape: f32[1,128], index: 1, kind: input, shape index: {}]   ;;  %s1309_s2 = inlined_call_operand.vmem [shape: f32[1,128], index: 2, kind: input, shape index: {}]   ;;  %s1310_s3 = inlined_call_operand.hbm [shape: f32[512,128], index: 3, kind: output, shape index: {}]  }
   0x1   :  { %10 = vsyncpa [#allocation3 + $0x1], 0 }
   0x2   :  { %11 = vsyncpa [#allocation4], 0 }
   0x3   :  { %13 = vsyncpa [#allocation4 + $0x1], 0  ;;  %s1016_s12 = smov 0   ;;  %s1018_s13 = smov 0  }
   0x4   :  { %s1020_s14 = smov 0   ;;  %s1022_s15 = smov 0  }
   0x5 LB: > { %s1037_s16 = sadd.s32 4294967295, %s986_s15   ;;  %s670_s17 = sadd.s32 4294967294, %s986_s15   ;;  %s986_s15 = sphi %s1022_s15, %s1324_s15   ;;  %s982_s14 = sphi %s1020_s14, %s1323_s14   ;;  %s978_s13 = sphi %s1018_s13, %s1322_s13   ;;  %s974_s12 = sphi %s1016_s12, %s1321_s12  }
   0x6   : > { %s1041_s18 = sadd.s32 1, %s986_s15   ;;  %s26_s19 = sadd.s32 1, %s982_s14 }
   0x7   : > { %s23_s20 = ssub.s32 %s986_s15, %s1041_s18  ;;  %p33_p0 = scmp.ne.s32.totalorder %s982_s14, %s978_s13 }
   0x8   : > { %p24_p1 = scmp.eq.s32.totalorder %s23_s20, 0  ;;  %p34_p2 = scmp.eq.s32.totalorder %s986_s15, 0 }
   0x9   : > { %p39_p3 = scmp.ne.s32.totalorder %s978_s13, %s974_s12  ;;  %p40_p4 = scmp.eq.s32.totalorder %s1037_s16, 0 }
   0xa   : > { %s1053_s21 = scalar_select %p24_p1, %s982_s14, %s26_s19  }
   0xb   : > { %p1055_p5 = por %p34_p2, %p33_p0  ;;  %p1059_p6 = por %p40_p4, %p39_p3 }
   0xc   : > { %p105_p7 = scmp.eq.s32.totalorder %s1037_s16, 7  ;;  %p111_p8 = scmp.eq.s32.totalorder %s670_s17, 7 }
   0xd   : > { %s1314_s23 = scalar_select %p1059_p6, 1, 0 }
   0xe   : > { %p836_p9 = scmp.lt.s32.totalorder %s986_s15, 8  ;;  %p1065_p10 = por %p105_p7, %p33_p0 }
   0xf   : > { %p1069_p11 = por %p111_p8, %p39_p3  ;;  %s137_s26 = sand.u32 1, %s982_s14  }
  0x10   : > { %s1315_s24 = scalar_select %p1065_p10, 1, 0 }
  0x11   : > { %s1316_s25 = scalar_select %p1069_p11, 1, 0 }
  0x12   : > { %s686_s27 = sshll.u32 %s986_s15, 10  ;;  %s673_s28 = sshll.u32 %s137_s26, 6 }
  0x13   : > { %s1078_s4 = scalar_lea.hbm %s1307_s0, %s686_s27  ;;  %s141_s5 = scalar_lea.vmem [#allocation2], %s673_s28 }
  0x14   : > { %s148_s6 = sshll.u32 %s141_s5, 4  ;;  %p1082_p12 = pnand %p836_p9, %p1055_p5  ;;  %s1086_s6 = int_to_ptr.vmem [resolvable:$true] %s148_s6 }
  0x15   : > { %s1088_s8 = scalar_lea.sflag [#allocation3], %s137_s26  ;;  %s894_s9 = scalar_lea.hbm %s1078_s4, 1024 }
  0x16   : > { %p895_p13 = scmp.ne.s32.totalorder %s1078_s4, %s894_s9  ;;  %p896_p0 = pneg %p1082_p12 }
  0x17   : > { %s899_s17 = scalar_lea.hbm %s1307_s0, 8192  ;;  %p900_p3 = scmp.lt.s32.totalorder %s1078_s4, %s1307_s0 }
  0x18   : > { %p897_p1 = pnand %p896_p0, %p895_p13  ;;  %p901_p4 = scmp.lt.s32.totalorder %s899_s17, %s894_s9 }
  0x1a   : > { %p898_p2 = pneg %p897_p1  ;;  %p902_p5 = por %p901_p4, %p900_p3 }
  0x1c   : > { %p903_p7 = pnand %p902_p5, %p898_p2 }
  0x1e   : > { %906 = shalt.err (!%p903_p7)
}
  0x1f   : > { %s907_s22 = scalar_lea.vmem %s1086_s6, 1024  ;;  %s988_s26 = smov [#allocation2]  }
  0x20   : > { %p908_p8 = scmp.ne.s32.totalorder %s1086_s6, %s907_s22  ;;  %s912_s27 = sshll.u32 %s988_s26, 4  ;;  %s913_s27 = int_to_ptr.vmem [resolvable:$false] %s912_s27 }
  0x21   : > { %s914_s28 = scalar_lea.vmem %s913_s27, 2048  ;;  %p915_p1 = scmp.lt.s32.totalorder %s1086_s6, %s913_s27 }
  0x22   : > { %p910_p9 = pnand %p908_p8, %p896_p0  ;;  %p916_p11 = scmp.lt.s32.totalorder %s914_s28, %s907_s22 }
  0x24   : > { %p911_p13 = pneg %p910_p9  ;;  %p917_p10 = por %p916_p11, %p915_p1 }
  0x26   : > { %p918_p6 = pnand %p917_p10, %p911_p13 }
  0x28   : > { %921 = shalt.err (!%p918_p6)
}
  0x29   : > { %s989_s29 = smov 128   ;;  %s990_s30 = smov 8  }
  0x2a   : > { %831 = dma.hbm_to_vmem [thread:$0]  (!%p1082_p12), %s1078_s4, 1024, %s1086_s6, %s1088_s8, %s989_s29, %s989_s29, %s990_s30  }
  0x2b   : > { %p676_p0 = scmp.ge.s32.totalorder %s986_s15, 1  ;;  %p156_p2 = scmp.lt.s32.totalorder %s986_s15, 9 }
  0x2d   : > { %p157_p3 = pnand %p676_p0, %p156_p2 }
  0x2e   : > { %s1112_s5 = sand.u32 (!%p157_p3), 1, %s978_s13   ;;  %p1318_p6 = scmp.ne.s32.totalorder (!%p157_p3), %s1314_s23, 0 }
  0x2f   : > { %160 = sbr.rel (%p157_p3) target bundleno = 784 (0x310), region = 32  ;;  %s677_s9 = sshll.u32 (!%p157_p3), %s1112_s5, 6 }
  0x30   : > { %s163_s10 = scalar_lea.sflag (!%p157_p3), [#allocation3], %s1112_s5  ;;  %s1118_s11 = scalar_lea.vmem (!%p157_p3), [#allocation2], %s677_s9 }
  0x34   : > { %965 = dma.done.wait (%p1318_p6), %s163_s10, 1024  }
  0x35   : > { %967 = vsyncadd (%p1318_p6), %s163_s10, 4294966272  ;;  %v991_v0 = vmov 1.0   ;;  %v1138_v1 = vld [vmem:[%s1118_s11] sm:$0xff]  ;;  %v192_v2 = vld [vmem:[%s1118_s11 + $0x8] sm:$0xff]  ;;  %v992_v9 = vmov 0   ;;  %s1243_s8 = scalar_lea.vmem [#allocation5], %s677_s9 }
  0x36   : > { %736 = vmatprep.subr.mxu0 %v991_v0  ;;  %780 = vmatprep.subr.mxu1 %v991_v0  ;;  %v193_v3 = vld [vmem:[%s1118_s11 + $0x10] sm:$0xff]  ;;  %v194_v4 = vld [vmem:[%s1118_s11 + $0x18] sm:$0xff]  ;;  %v195_v5 = vld [vmem:[%s1118_s11 + $0x20] sm:$0xff]  ;;  %s687_s17 = sshll.u32 %s1037_s16, 10  ;;  %s597_s19 = sshll.u32 %s1243_s8, 4  ;;  %s1263_s19 = int_to_ptr.vmem [resolvable:$true] %s597_s19 }
  0x37   : > { %737 = vmatpush3.msra.mxu0 %v991_v0  ;;  %781 = vmatpush3.msra.mxu1 %v991_v0  ;;  %v196_v6 = vld [vmem:[%s1118_s11 + $0x28] sm:$0xff]  ;;  %v197_v7 = vld [vmem:[%s1118_s11 + $0x30] sm:$0xff]  ;;  %v198_v8 = vld [vmem:[%s1118_s11 + $0x38] sm:$0xff]  ;;  %s1261_s26 = scalar_lea.hbm %s1310_s3, %s687_s17  ;;  %s584_s27 = scalar_lea.sflag [#allocation4], %s1112_s5 }
  0x38   : > { %738 = vmatprep.subr.mxu0 %v991_v0  ;;  %782 = vmatprep.subr.mxu1 %v991_v0  ;;  %s922_s28 = scalar_lea.vmem %s1263_s19, 1024  ;;  %p1319_p11 = scmp.ne.s32.totalorder %s1315_s24, 0 }
  0x39   : > { %739 = vmatpush3.msra.mxu0 %v991_v0  ;;  %783 = vmatpush3.msra.mxu1 %v991_v0  ;;  %p923_p10 = scmp.ne.s32.totalorder %s1263_s19, %s922_s28  ;;  %s993_s16 = smov [#allocation5]  }
  0x3a   : > { %740 = vmatprep.subr.mxu0 %v991_v0  ;;  %784 = vmatprep.subr.mxu1 %v991_v0  ;;  %s926_s29 = sshll.u32 %s993_s16, 4  ;;  %s927_s29 = int_to_ptr.vmem [resolvable:$false] %s926_s29 }
  0x3b   : > { %741 = vmatpush3.msra.mxu0 %v991_v0  ;;  %785 = vmatpush3.msra.mxu1 %v991_v0  ;;  %p924_p12 = pnand %p923_p10, %p1319_p11  ;;  %s928_s30 = scalar_lea.vmem %s927_s29, 2048 }
  0x3c   : > { %742 = vmatprep.subr.mxu0 %v991_v0  ;;  %786 = vmatprep.subr.mxu1 %v991_v0  ;;  %p929_p5 = scmp.lt.s32.totalorder %s1263_s19, %s927_s29  ;;  %p930_p7 = scmp.lt.s32.totalorder %s928_s30, %s922_s28 }
  0x3d   : > { %743 = vmatpush3.msra.mxu0 %v991_v0  ;;  %768 = vmatprep.mubr.f32.mxu0 %v1138_v1  ;;  %p925_p4 = pneg %p924_p12 }
  0x3e   : > { %744 = vmatprep.subr.mxu0 %v991_v0  ;;  %787 = vmatpush3.msra.mxu1 %v991_v0  ;;  %p931_p8 = por %p930_p7, %p929_p5 }
  0x3f   : > { %745 = vmatpush3.msra.mxu0 %v991_v0  ;;  %788 = vmatprep.subr.mxu1 %v991_v0 }
  0x40   : > { %746 = vmatprep.subr.mxu0 %v991_v0  ;;  %789 = vmatpush3.msra.mxu1 %v991_v0  ;;  %p932_p9 = pnand %p931_p8, %p925_p4 }
  0x41   : > { %747 = vmatpush3.msra.mxu0 %v991_v0  ;;  %790 = vmatprep.subr.mxu1 %v991_v0 }
  0x42   : > { %748 = vmatprep.subr.mxu0 %v991_v0  ;;  %791 = vmatpush3.msra.mxu1 %v991_v0 }
  0x43   : > { %749 = vmatpush3.msra.mxu0 %v991_v0  ;;  %792 = vmatprep.subr.mxu1 %v991_v0 }
  0x44   : > { %750 = vmatprep.subr.mxu0 %v991_v0  ;;  %793 = vmatpush3.msra.mxu1 %v991_v0 }
  0x45   : > { %751 = vmatpush3.msra.mxu0 %v991_v0  ;;  %794 = vmatprep.subr.mxu1 %v991_v0 }
  0x46   : > { %752 = vmatprep.subr.mxu0 %v991_v0  ;;  %795 = vmatpush3.msra.mxu1 %v991_v0 }
  0x47   : > { %753 = vmatpush3.msra.mxu0 %v991_v0  ;;  %796 = vmatprep.subr.mxu1 %v991_v0 }
  0x48   : > { %754 = vmatprep.subr.mxu0 %v991_v0  ;;  %797 = vmatpush3.msra.mxu1 %v991_v0 }
  0x49   : > { %755 = vmatpush3.msra.mxu0 %v991_v0  ;;  %798 = vmatprep.subr.mxu1 %v991_v0 }
  0x4a   : > { %756 = vmatprep.subr.mxu0 %v991_v0  ;;  %799 = vmatpush3.msra.mxu1 %v991_v0 }
  0x4b   : > { %757 = vmatpush3.msra.mxu0 %v991_v0  ;;  %800 = vmatprep.subr.mxu1 %v991_v0 }
  0x4c   : > { %758 = vmatprep.subr.mxu0 %v991_v0  ;;  %801 = vmatpush3.msra.mxu1 %v991_v0 }
  0x4d   : > { %759 = vmatpush3.msra.mxu0 %v991_v0  ;;  %802 = vmatprep.subr.mxu1 %v991_v0 }
  0x4e   : > { %760 = vmatprep.subr.mxu0 %v991_v0  ;;  %803 = vmatpush3.msra.mxu1 %v991_v0 }
  0x4f   : > { %761 = vmatpush3.msra.mxu0 %v991_v0  ;;  %804 = vmatprep.subr.mxu1 %v991_v0 }
  0x50   : > { %762 = vmatprep.subr.mxu0 %v991_v0  ;;  %805 = vmatpush3.msra.mxu1 %v991_v0 }
  0x51   : > { %763 = vmatpush3.msra.mxu0 %v991_v0  ;;  %806 = vmatprep.subr.mxu1 %v991_v0 }
  0x52   : > { %764 = vmatprep.subr.mxu0 %v991_v0  ;;  %807 = vmatpush3.msra.mxu1 %v991_v0 }
  0x53   : > { %765 = vmatpush3.msra.mxu0 %v991_v0  ;;  %808 = vmatprep.subr.mxu1 %v991_v0 }
  0x54   : > { %766 = vmatprep.subr.mxu0 %v991_v0  ;;  %809 = vmatpush3.msra.mxu1 %v991_v0 }
  0x55   : > { %767 = vmatpush3.msra.mxu0 %v991_v0  ;;  %810 = vmatprep.subr.mxu1 %v991_v0 }
  0x56   : > { %769 = vmatmul.mubr.f32.vlgmr.msra.gmra.mxu0 %v192_v2  ;;  %811 = vmatpush3.msra.mxu1 %v991_v0 }
  0x57   : > { %771 = vmatprep.mubr.f32.mxu0 %v193_v3  ;;  %876 = vset.pattern.permute.xlu0 %v992_v9 }
  0x58   : > { %877 = vset.pattern.permute.xlu1 %v992_v9 }
  0x5a   : > { %772 = vmatmul.mubr.f32.gmra.mxu0 %v194_v4 }
  0x5b   : > { %774 = vmatprep.mubr.f32.mxu0 %v195_v5 }
  0x5e   : > { %775 = vmatmul.mubr.f32.gmra.mxu0 %v196_v6 }
  0x5f   : > { %777 = vmatprep.mubr.f32.mxu0 %v197_v7 }
  0x62   : > { %778 = vmatmul.mubr.f32.gmra.mxu0 %v198_v8 }
 0x116   : > { %v770_v10 = vpop.f32.mrf.mxu0 }
 0x117   : > { %v305_v15 = vmul.f32 0.0078125, %v770_v10 }
 0x118   : > { %v265_v11 = vpop.f32.mrf.mxu0 }
 0x119   : > { %v304_v12 = vmul.f32 0.0078125, %v265_v11 }
 0x11a   : > { %v773_v13 = vpop.f32.mrf.mxu0 }
 0x11b   : > { %314 = vperm.xlu0 %876, %v304_v12   ;;  %v307_v19 = vmul.f32 0.0078125, %v773_v13 }
 0x11c   : > { %v275_v14 = vpop.f32.mrf.mxu0 }
 0x11d   : > { %v306_v16 = vmul.f32 0.0078125, %v275_v14 }
 0x11e   : > { %v776_v17 = vpop.f32.mrf.mxu0 }
 0x11f   : > { %319 = vperm.xlu0 %876, %v305_v15   ;;  %324 = vperm.xlu1 %877, %v306_v16   ;;  %v309_v23 = vmul.f32 0.0078125, %v776_v17 }
 0x120   : > { %v285_v18 = vpop.f32.mrf.mxu0 }
 0x121   : > { %v308_v20 = vmul.f32 0.0078125, %v285_v18  ;;  %v679_v18 = vld [vmem:[%s1308_s1] ss:$0 sm:$0xff] }
 0x122   : > { %v779_v21 = vpop.f32.mrf.mxu0 }
 0x123   : > { %329 = vperm.xlu1 %877, %v307_v19   ;;  %334 = vperm.xlu0 %876, %v308_v20   ;;  %v311_v25 = vmul.f32 0.0078125, %v779_v21  ;;  %v680_v21 = vld [vmem:[%s1309_s2] ss:$0 sm:$0xff] }
 0x124   : > { %v295_v22 = vpop.f32.mrf.mxu0 }
 0x125   : > { %v310_v24 = vmul.f32 0.0078125, %v295_v22 }
 0x127   : > { %339 = vperm.xlu1 %877, %v309_v23   ;;  %344 = vperm.xlu0 %876, %v310_v24  }
 0x12b   : > { %349 = vperm.xlu1 %877, %v311_v25  }
 0x196   : > { %v315_v26 = vpop.permute.xlu0 %314 }
 0x197   : > { %v1200_v27 = vsub.f32 %v1138_v1, %v315_v26 }
 0x199   : > { %v360_v28 = vmul.f32 %v1200_v27, %v1200_v27 }
 0x19a   : > { %v320_v29 = vpop.permute.xlu0 %319  ;;  %v325_v30 = vpop.permute.xlu1 %324 }
 0x19b   : > { %v1204_v31 = vsub.f32 %v192_v2, %v320_v29  ;;  %v1206_v32 = vsub.f32 %v193_v3, %v325_v30  ;;  %812 = vmatprep.mubr.f32.mxu1 %v360_v28 }
 0x19d   : > { %v361_v33 = vmul.f32 %v1204_v31, %v1204_v31  ;;  %v362_v34 = vmul.f32 %v1206_v32, %v1206_v32 }
 0x19e   : > { %v330_v35 = vpop.permute.xlu1 %329  ;;  %v335_v36 = vpop.permute.xlu0 %334 }
 0x19f   : > { %v1212_v37 = vsub.f32 %v194_v4, %v330_v35  ;;  %v1214_v38 = vsub.f32 %v195_v5, %v335_v36  ;;  %813 = vmatmul.mubr.f32.vlgmr.msra.gmra.mxu1 %v361_v33 }
 0x1a0   : > { %815 = vmatprep.mubr.f32.mxu1 %v362_v34 }
 0x1a1   : > { %v363_v39 = vmul.f32 %v1212_v37, %v1212_v37  ;;  %v364_v40 = vmul.f32 %v1214_v38, %v1214_v38 }
 0x1a2   : > { %v340_v41 = vpop.permute.xlu1 %339  ;;  %v345_v42 = vpop.permute.xlu0 %344 }
 0x1a3   : > { %v1220_v43 = vsub.f32 %v196_v6, %v340_v41  ;;  %v1222_v44 = vsub.f32 %v197_v7, %v345_v42  ;;  %816 = vmatmul.mubr.f32.gmra.mxu1 %v363_v39 }
 0x1a4   : > { %818 = vmatprep.mubr.f32.mxu1 %v364_v40 }
 0x1a5   : > { %v365_v45 = vmul.f32 %v1220_v43, %v1220_v43  ;;  %v366_v46 = vmul.f32 %v1222_v44, %v1222_v44 }
 0x1a6   : > { %v350_v47 = vpop.permute.xlu1 %349 }
 0x1a7   : > { %v1228_v48 = vsub.f32 %v198_v8, %v350_v47  ;;  %819 = vmatmul.mubr.f32.gmra.mxu1 %v365_v45 }
 0x1a8   : > { %821 = vmatprep.mubr.f32.mxu1 %v366_v46 }
 0x1a9   : > { %v367_v49 = vmul.f32 %v1228_v48, %v1228_v48 }
 0x1ab   : > { %822 = vmatmul.mubr.f32.gmra.mxu1 %v367_v49 }
 0x25f   : > { %v814_v50 = vpop.f32.mrf.mxu1 }
 0x260   : > { %v474_v51 = vmul.f32 0.0078125, %v814_v50 }
 0x261   : > { %v434_v52 = vpop.f32.mrf.mxu1 }
 0x262   : > { %v482_v53 = vadd.f32 1e-05, %v474_v51  ;;  %v473_v54 = vmul.f32 0.0078125, %v434_v52 }
 0x263   : > { %v817_v55 = vpop.f32.mrf.mxu1 }
 0x264   : > { %878 = vrsqrt.f32 %v482_v53  ;;  %v481_v56 = vadd.f32 1e-05, %v473_v54  ;;  %v476_v57 = vmul.f32 0.0078125, %v817_v55 }
 0x265   : > { %v444_v58 = vpop.f32.mrf.mxu1 }
 0x266   : > { %880 = vrsqrt.f32 %v481_v56  ;;  %v484_v59 = vadd.f32 1e-05, %v476_v57  ;;  %v475_v60 = vmul.f32 0.0078125, %v444_v58 }
 0x267   : > { %v820_v61 = vpop.f32.mrf.mxu1 }
 0x268   : > { %882 = vrsqrt.f32 %v484_v59  ;;  %v483_v62 = vadd.f32 1e-05, %v475_v60  ;;  %v478_v63 = vmul.f32 0.0078125, %v820_v61 }
 0x269   : > { %v454_v0 = vpop.f32.mrf.mxu1 }
 0x26a   : > { %884 = vrsqrt.f32 %v483_v62  ;;  %v486_v1 = vadd.f32 1e-05, %v478_v63  ;;  %v477_v2 = vmul.f32 0.0078125, %v454_v0 }
 0x26b   : > { %v823_v3 = vpop.f32.mrf.mxu1 }
 0x26c   : > { %886 = vrsqrt.f32 %v486_v1  ;;  %v485_v4 = vadd.f32 1e-05, %v477_v2  ;;  %v480_v5 = vmul.f32 0.0078125, %v823_v3 }
 0x26d   : > { %v464_v6 = vpop.f32.mrf.mxu1 }
 0x26e   : > { %888 = vrsqrt.f32 %v485_v4  ;;  %v488_v7 = vadd.f32 1e-05, %v480_v5  ;;  %v479_v8 = vmul.f32 0.0078125, %v464_v6 }
 0x270   : > { %890 = vrsqrt.f32 %v488_v7  ;;  %v487_v9 = vadd.f32 1e-05, %v479_v8 }
 0x271   : > { %v879_v10 = vpop.eup %878 }
 0x272   : > { %892 = vrsqrt.f32 %v487_v9  ;;  %506 = vperm.xlu1 %877, %v879_v10  }
 0x273   : > { %v881_v11 = vpop.eup %880 }
 0x274   : > { %501 = vperm.xlu0 %876, %v881_v11  }
 0x275   : > { %v883_v12 = vpop.eup %882 }
 0x276   : > { %516 = vperm.xlu1 %877, %v883_v12  }
 0x277   : > { %v885_v13 = vpop.eup %884 }
 0x278   : > { %511 = vperm.xlu0 %876, %v885_v13  }
 0x279   : > { %v887_v14 = vpop.eup %886 }
 0x27a   : > { %526 = vperm.xlu1 %877, %v887_v14  }
 0x27b   : > { %v889_v15 = vpop.eup %888 }
 0x27c   : > { %521 = vperm.xlu0 %876, %v889_v15  }
 0x27d   : > { %v891_v16 = vpop.eup %890 }
 0x27e   : > { %536 = vperm.xlu1 %877, %v891_v16  }
 0x27f   : > { %v893_v17 = vpop.eup %892 }
 0x280   : > { %531 = vperm.xlu0 %876, %v893_v17  }
 0x2ed   : > { %v507_v19 = vpop.permute.xlu1 %506 }
 0x2ee   : > { %v540_v20 = vmul.f32 %v507_v19, %v1204_v31 }
 0x2ef   : > { %v502_v22 = vpop.permute.xlu0 %501 }
 0x2f0   : > { %v554_v23 = vmul.f32 %v679_v18, %v540_v20  ;;  %v539_v24 = vmul.f32 %v502_v22, %v1200_v27 }
 0x2f1   : > { %v517_v25 = vpop.permute.xlu1 %516 }
 0x2f2   : > { %v568_v26 = vadd.f32 %v680_v21, %v554_v23  ;;  %v553_v28 = vmul.f32 %v679_v18, %v539_v24  ;;  %v542_v29 = vmul.f32 %v517_v25, %v1212_v37 }
 0x2f3   : > { %v512_v30 = vpop.permute.xlu0 %511 }
 0x2f4   : > { %576 = vst [vmem:[%s1243_s8 + $0x8] sm:$0xff] %v568_v26  ;;  %v567_v31 = vadd.f32 %v680_v21, %v553_v28  ;;  %v556_v33 = vmul.f32 %v679_v18, %v542_v29  ;;  %v541_v34 = vmul.f32 %v512_v30, %v1206_v32 }
 0x2f5   : > { %v527_v35 = vpop.permute.xlu1 %526 }
 0x2f6   : > { %575 = vst [vmem:[%s1243_s8] sm:$0xff] %v567_v31  ;;  %v570_v27 = vadd.f32 %v680_v21, %v556_v33  ;;  %v555_v36 = vmul.f32 %v679_v18, %v541_v34  ;;  %v544_v37 = vmul.f32 %v527_v35, %v1220_v43 }
 0x2f7   : > { %v522_v39 = vpop.permute.xlu0 %521 }
 0x2f8   : > { %578 = vst [vmem:[%s1243_s8 + $0x18] sm:$0xff] %v570_v27  ;;  %v569_v40 = vadd.f32 %v680_v21, %v555_v36  ;;  %v558_v41 = vmul.f32 %v679_v18, %v544_v37  ;;  %v543_v42 = vmul.f32 %v522_v39, %v1214_v38 }
 0x2f9   : > { %v537_v45 = vpop.permute.xlu1 %536 }
 0x2fa   : > { %577 = vst [vmem:[%s1243_s8 + $0x10] sm:$0xff] %v569_v40  ;;  %v572_v32 = vadd.f32 %v680_v21, %v558_v41  ;;  %v557_v46 = vmul.f32 %v679_v18, %v543_v42  ;;  %v546_v47 = vmul.f32 %v537_v45, %v1228_v48 }
 0x2fb   : > { %v532_v49 = vpop.permute.xlu0 %531 }
 0x2fc   : > { %580 = vst [vmem:[%s1243_s8 + $0x28] sm:$0xff] %v572_v32  ;;  %v571_v43 = vadd.f32 %v680_v21, %v557_v46  ;;  %v560_v50 = vmul.f32 %v679_v18, %v546_v47  ;;  %v545_v51 = vmul.f32 %v532_v49, %v1222_v44 }
 0x2fe   : > { %579 = vst [vmem:[%s1243_s8 + $0x20] sm:$0xff] %v571_v43  ;;  %v574_v38 = vadd.f32 %v680_v21, %v560_v50  ;;  %v559_v52 = vmul.f32 %v679_v18, %v545_v51 }
 0x300   : > { %582 = vst [vmem:[%s1243_s8 + $0x38] sm:$0xff] %v574_v38  ;;  %v573_v48 = vadd.f32 %v680_v21, %v559_v52 }
 0x302   : > { %581 = vst [vmem:[%s1243_s8 + $0x30] sm:$0xff] %v573_v48 }
 0x303   : > { %935 = shalt.err (!%p932_p9)
}
 0x304   : > { %s936_s9 = scalar_lea.hbm %s1261_s26, 1024  ;;  %s940_s23 = scalar_lea.hbm %s1310_s3, 8192 }
 0x305   : > { %p937_p13 = scmp.ne.s32.totalorder %s1261_s26, %s936_s9  ;;  %p941_p2 = scmp.lt.s32.totalorder %s1261_s26, %s1310_s3 }
 0x306   : > { %p942_p3 = scmp.lt.s32.totalorder %s940_s23, %s936_s9 }
 0x307   : > { %p938_p1 = pnand %p937_p13, %p1319_p11 }
 0x308   : > { %p943_p6 = por %p942_p3, %p941_p2 }
 0x309   : > { %p939_p0 = pneg %p938_p1 }
 0x30b   : > { %p944_p10 = pnand %p943_p6, %p939_p0 }
 0x30d   : > { %947 = shalt.err (!%p944_p10)
}
 0x30e   : > { %s994_s7 = smov 128   ;;  %s995_s8 = smov 8  }
 0x30f   : > { %826 = dma.vmem_to_hbm [thread:$0]  (%p1319_p11), %s1263_s19, 1024, %s1261_s26, %s584_s27, %s994_s7, %s994_s7, %s995_s8  }
 0x310 PF: > { %p837_p12 = scmp.ge.s32.totalorder %s986_s15, 2  ;;  %s612_s17 = sand.u32 1, %s974_s12  }
 0x311   : > { %p1320_p4 = scmp.ne.s32.totalorder %s1316_s25, 0  ;;  %s613_s20 = scalar_lea.sflag [#allocation4], %s612_s17 }
 0x313   : > { %p833_p5 = pnand %p837_p12, %p1320_p4 }
 0x315   : > { %p834_p7 = pneg %p833_p5 }
 0x317   : > { %969 = dma.done.wait (%p834_p7), %s613_s20, 1024  }
 0x318   : > { %971 = vsyncadd (%p834_p7), %s613_s20, 4294966272  ;;  %p16_p8 = scmp.ge.s32.totalorder %s1041_s18, 10   ;;  %s1321_s12 = smov %s978_s13 }
 0x319   : > { %s1322_s13 = smov %s982_s14  ;;  %s1323_s14 = smov %s1053_s21 }
 0x31a   : > { %s1324_s15 = smov %s1041_s18  ;;  %18 = sbr.rel (!%p16_p8) target bundleno = 5 (0x5), region = 77 }
 0x31f   :  { %618 = vsyncpa [#allocation3], 1 }
 0x320   :  { %620 = vsyncpa [#allocation3 + $0x1], 1 }
 0x321   :  { %621 = vsyncpa [#allocation4], 1 }
 0x322   :  { %623 = vsyncpa [#allocation4 + $0x1], 1 }

</bundles_post_ra>
